<compile_context>
chip_gen: v7x
topology: tpu7x:2x2x1
jax: 0.10.0
libtpu: 0.0.40
codegen_flags: <defaults>
</compile_context>

<pallas_src>
import functools

import jax
import jax.numpy as jnp
from jax.experimental import pallas as pl
from jax.experimental.pallas import tpu as pltpu

_HIDDEN = 50
_TILE_CAP = 32768                     # lanes per grid step (multiple of 128)
_VMEM_LIMIT = 48 * 1024 * 1024        # fits v7x (64 MiB) and v5e/v6e (128 MiB)


def _round_up(v, m):
    return ((v + m - 1) // m) * m


def _device_kind():
    try:
        return jax.devices()[0].device_kind.lower()
    except Exception:
        return ""


def _default_act_dtype():
    """bf16 activations only where the VPU/EUP supports bf16 (v6e/v7x)."""
    # NOTE: picked at trace time from the default backend; pass act_dtype
    # explicitly under AOT / cross-compilation setups.
    kind = _device_kind()
    if "v6" in kind or "v7" in kind:
        return jnp.bfloat16
    return jnp.float32   # v5e and older: no bf16 vector path -> keep f32


# --------------------------------------------------------------------------- #
# Pallas kernel: fused 3-layer MLP, batch on lanes, all matmuls on the MXU
# --------------------------------------------------------------------------- #
def _pinn_mlp_kernel(inp_ref, w1_ref, b1_ref, w2_ref, b2_ref, w3_ref, b3_ref,
                     out_ref, *, act_dtype):
    # inp: (3, tm) f32          w1: (50, 3)  f32        b1: (50, 1) act_dtype
    #                           w2: (50, 50) act_dtype  b2: (50, 1) act_dtype
    #                           w3: (1, 50)  act_dtype  b3: (1, 1)  f32
    # out: (1, tm) f32  <- lane-dense output block
    inp = inp_ref[...]

    # Layer 1 (50x3): MXU matmul, f32 accumulation; bias add + tanh in
    # act_dtype (half-width on v6e/v7x).
    z1 = jnp.dot(w1_ref[...], inp, preferred_element_type=jnp.float32)
    h1 = jnp.tanh(z1.astype(act_dtype) + b1_ref[...])           # (50, tm)

    # Layer 2 (50x50): MXU, f32 accumulation; downcast before bias/tanh.
    z2 = jnp.dot(w2_ref[...], h1, preferred_element_type=jnp.float32)
    h2 = jnp.tanh(z2.astype(act_dtype) + b2_ref[...])           # (50, tm)

    # Layer 3 (1x50): MXU with its N dim = tm (lane-dense), f32 output.
    z3 = jnp.dot(w3_ref[...], h2,
                 preferred_element_type=jnp.float32) + b3_ref[...]
    out_ref[...] = z3.astype(out_ref.dtype)                     # (1, tm)


# --------------------------------------------------------------------------- #
# Wrapper
# --------------------------------------------------------------------------- #
def pinn_forward(x, y, t, params, *, batch_tile=None, act_dtype=None):
    """PINN forward. x, y, t: (N, 1) arrays. Returns (N, 1) float32."""
    n = x.shape[0]
    if act_dtype is None:
        act_dtype = _default_act_dtype()

    # Fold torch.cat([x, y, t], dim=1) + transpose into one (3, N) slab.
    inp3 = jnp.stack(
        [jnp.asarray(x, jnp.float32).reshape(n),
         jnp.asarray(y, jnp.float32).reshape(n),
         jnp.asarray(t, jnp.float32).reshape(n)], axis=0)       # (3, N)

    # Lane-axis tile: multiple of 128, grid >= 2 and even (so the "parallel"
    # batch axis shards across both TensorCores on v7x), tile capped so the
    # (50, tm) activation temporaries stay inside the 48 MiB scoped-VMEM budget.
    if batch_tile is None:
        g = max(2, pl.cdiv(n, _TILE_CAP))
        if g % 2:
            g += 1
        tm = max(128, _round_up(pl.cdiv(n, g), 128))
    else:
        tm = batch_tile
        assert tm % 128 == 0, "batch_tile must be a multiple of 128 (lane axis)"
        g = pl.cdiv(n, tm)

    n_pad = g * tm
    if n_pad != n:
        inp3 = jnp.pad(inp3, ((0, 0), (0, n_pad - n)))  # zero tail, sliced off

    w1 = jnp.asarray(params["w1"], jnp.float32)   # (50, 3)  f32 (MXU has slack)
    b1 = jnp.asarray(params["b1"], act_dtype)     # (50, 1)
    w2 = jnp.asarray(params["w2"], act_dtype)     # (50, 50)
    b2 = jnp.asarray(params["b2"], act_dtype)     # (50, 1)
    w3 = jnp.asarray(params["w3"], act_dtype)     # (1, 50)
    b3 = jnp.asarray(params["b3"], jnp.float32)   # (1, 1)

    grid = (g,)
    resident = lambda i: (0, 0)
    tiled = lambda i: (0, i)

    cost = pl.CostEstimate(
        flops=2 * n_pad * (3 * _HIDDEN + _HIDDEN * _HIDDEN + _HIDDEN),
        transcendentals=2 * _HIDDEN * n_pad,
        bytes_accessed=4 * 4 * n_pad + 4 * (w1.size + w2.size + w3.size
                                            + b1.size + b2.size + b3.size),
    )

    out = pl.pallas_call(
        functools.partial(_pinn_mlp_kernel, act_dtype=act_dtype),
        out_shape=jax.ShapeDtypeStruct((1, n_pad), jnp.float32),
        grid_spec=pltpu.PrefetchScalarGridSpec(
            num_scalar_prefetch=0,
            grid=grid,
            in_specs=[
                pl.BlockSpec((3, tm), tiled),       # stacked [x;y;t] slab
                pl.BlockSpec(w1.shape, resident),   # weights/biases resident
                pl.BlockSpec(b1.shape, resident),
                pl.BlockSpec(w2.shape, resident),
                pl.BlockSpec(b2.shape, resident),
                pl.BlockSpec(w3.shape, resident),
                pl.BlockSpec(b3.shape, resident),
            ],
            out_specs=pl.BlockSpec((1, tm), tiled),
        ),
        compiler_params=pltpu.CompilerParams(
            dimension_semantics=("parallel",),
            vmem_limit_bytes=_VMEM_LIMIT,
        ),
        cost_estimate=cost,
    )(inp3, w1, b1, w2, b2, w3, b3)

    return out[:, :n].reshape(n, 1)


# --------------------------------------------------------------------------- #
# Deterministic parameter init (nn.Linear's U(-1/sqrt(fan_in), +...)),
# weights kept in the PyTorch (out_features, in_features) convention.
# --------------------------------------------------------------------------- #
def init_params(key):
    def linear(key, fan_in, fan_out):
        kw, kb = jax.random.split(key)
        bound = 1.0 / float(jnp.sqrt(jnp.float32(fan_in)))
        w = jax.random.uniform(kw, (fan_out, fan_in), jnp.float32,
                               minval=-bound, maxval=bound)
        b = jax.random.uniform(kb, (fan_out, 1), jnp.float32,
                               minval=-bound, maxval=bound)
        return w, b

    k1, k2, k3 = jax.random.split(key, 3)
    w1, b1 = linear(k1, 3, _HIDDEN)
    w2, b2 = linear(k2, _HIDDEN, _HIDDEN)
    w3, b3 = linear(k3, _HIDDEN, 1)
    return {"w1": w1, "b1": b1, "w2": w2, "b2": b2, "w3": w3, "b3": b3}


def _reference(x, y, t, params):
    inp = jnp.concatenate([x, y, t], axis=1)                     # (N, 3)
    h = jnp.tanh(inp @ params["w1"].T + params["b1"].T)
    h = jnp.tanh(h @ params["w2"].T + params["b2"].T)
    return h @ params["w3"].T + params["b3"].T                   # (N, 1)


if __name__ == "__main__":
    key = jax.random.PRNGKey(0)
    kp, kx, ky, kt = jax.random.split(key, 4)

    params = init_params(kp)

    N = 500  # collocation points; not a multiple of 128 -> exercises padding
    x = jax.random.uniform(kx, (N, 1), jnp.float32)
    y = jax.random.uniform(ky, (N, 1), jnp.float32)
    t = jax.random.uniform(kt, (N, 1), jnp.float32)

    act_dtype = _default_act_dtype()
    out = pinn_forward(x, y, t, params, act_dtype=act_dtype)
    out = jax.block_until_ready(out)

    ref = _reference(x, y, t, params)
    assert out.shape == (N, 1)
    if act_dtype == jnp.bfloat16:
        ok = jnp.allclose(out, ref, atol=5e-2, rtol=5e-2)
    else:
        ok = jnp.allclose(out, ref, atol=1e-5, rtol=1e-5)
    assert ok, "mismatch vs reference"

    print("KERNEL_OK")
</pallas_src>

<mosaic_0001>
module attributes {stable_mosaic.version = 11 : i64} {
  func.func @_pinn_mlp_kernel(%arg0: i32, %arg1: memref<3x256xf32, #tpu.memory_space<vmem>>, %arg2: memref<50x3xf32, #tpu.memory_space<vmem>>, %arg3: memref<50x1xf32, #tpu.memory_space<vmem>>, %arg4: memref<50x50xf32, #tpu.memory_space<vmem>>, %arg5: memref<50x1xf32, #tpu.memory_space<vmem>>, %arg6: memref<1x50xf32, #tpu.memory_space<vmem>>, %arg7: memref<1x1xf32, #tpu.memory_space<vmem>>, %arg8: memref<1x256xf32, #tpu.memory_space<vmem>>) attributes {dimension_semantics = [#tpu.dimension_semantics<parallel>], iteration_bounds = array<i64: 2>, scalar_prefetch = 0 : i64, scratch_operands = 0 : i64, tpu.core_type = #tpu.core_type<tc>, window_params = [{transform_indices = @transform_0, window_bounds = array<i64: 3, 256>}, {pipeline_mode = #tpu.pipeline_mode<synchronous>, transform_indices = @transform_1, window_bounds = array<i64: 50, 3>}, {pipeline_mode = #tpu.pipeline_mode<synchronous>, transform_indices = @transform_2, window_bounds = array<i64: 50, 1>}, {pipeline_mode = #tpu.pipeline_mode<synchronous>, transform_indices = @transform_3, window_bounds = array<i64: 50, 50>}, {pipeline_mode = #tpu.pipeline_mode<synchronous>, transform_indices = @transform_4, window_bounds = array<i64: 50, 1>}, {pipeline_mode = #tpu.pipeline_mode<synchronous>, transform_indices = @transform_5, window_bounds = array<i64: 1, 50>}, {pipeline_mode = #tpu.pipeline_mode<synchronous>, transform_indices = @transform_6, window_bounds = array<i64: 1, 1>}, {transform_indices = @transform_7, window_bounds = array<i64: 1, 256>}]} {
    %c0 = arith.constant 0 : index
    %c0_0 = arith.constant 0 : index
    %0 = vector.load %arg1[%c0, %c0_0] : memref<3x256xf32, #tpu.memory_space<vmem>>, vector<3x256xf32>
    %c0_1 = arith.constant 0 : index
    %c0_2 = arith.constant 0 : index
    %1 = vector.load %arg2[%c0_1, %c0_2] : memref<50x3xf32, #tpu.memory_space<vmem>>, vector<50x3xf32>
    %cst = arith.constant dense<0.000000e+00> : vector<50x256xf32>
    %2 = tpu.matmul %1, %0, %cst {dimension_numbers = #tpu.dot_dimension_numbers<[1], [0], [0], [1], [0, 0, 1, 1], [], []>} : vector<50x3xf32>, vector<3x256xf32>, vector<50x256xf32> -> vector<50x256xf32>
    %c0_3 = arith.constant 0 : index
    %c0_4 = arith.constant 0 : index
    %3 = vector.load %arg3[%c0_3, %c0_4] : memref<50x1xf32, #tpu.memory_space<vmem>>, vector<50x1xf32>
    %4 = vector.broadcast %3 : vector<50x1xf32> to vector<50x256xf32>
    %5 = arith.addf %2, %4 : vector<50x256xf32>
    %6 = math.tanh %5 : vector<50x256xf32>
    %c0_5 = arith.constant 0 : index
    %c0_6 = arith.constant 0 : index
    %7 = vector.load %arg4[%c0_5, %c0_6] : memref<50x50xf32, #tpu.memory_space<vmem>>, vector<50x50xf32>
    %cst_7 = arith.constant dense<0.000000e+00> : vector<50x256xf32>
    %8 = tpu.matmul %7, %6, %cst_7 {dimension_numbers = #tpu.dot_dimension_numbers<[1], [0], [0], [1], [0, 0, 1, 1], [], []>} : vector<50x50xf32>, vector<50x256xf32>, vector<50x256xf32> -> vector<50x256xf32>
    %c0_8 = arith.constant 0 : index
    %c0_9 = arith.constant 0 : index
    %9 = vector.load %arg5[%c0_8, %c0_9] : memref<50x1xf32, #tpu.memory_space<vmem>>, vector<50x1xf32>
    %10 = vector.broadcast %9 : vector<50x1xf32> to vector<50x256xf32>
    %11 = arith.addf %8, %10 : vector<50x256xf32>
    %12 = math.tanh %11 : vector<50x256xf32>
    %c0_10 = arith.constant 0 : index
    %c0_11 = arith.constant 0 : index
    %13 = vector.load %arg6[%c0_10, %c0_11] : memref<1x50xf32, #tpu.memory_space<vmem>>, vector<1x50xf32>
    %cst_12 = arith.constant dense<0.000000e+00> : vector<1x256xf32>
    %14 = tpu.matmul %13, %12, %cst_12 {dimension_numbers = #tpu.dot_dimension_numbers<[1], [0], [0], [1], [0, 0, 1, 1], [], []>} : vector<1x50xf32>, vector<50x256xf32>, vector<1x256xf32> -> vector<1x256xf32>
    %c0_13 = arith.constant 0 : index
    %c0_14 = arith.constant 0 : index
    %15 = vector.load %arg7[%c0_13, %c0_14] : memref<1x1xf32, #tpu.memory_space<vmem>>, vector<1x1xf32>
    %16 = vector.broadcast %15 : vector<1x1xf32> to vector<1x256xf32>
    %17 = arith.addf %14, %16 : vector<1x256xf32>
    %c0_15 = arith.constant 0 : index
    %c0_16 = arith.constant 0 : index
    %18 = vector.load %arg8[%c0_15, %c0_16] : memref<1x256xf32, #tpu.memory_space<vmem>>, vector<1x256xf32>
    tpu.vector_store %arg8[%c0_15, %c0_16], %17 {strides = array<i32>} : memref<1x256xf32, #tpu.memory_space<vmem>>, vector<1x256xf32>,
    return
  }
  func.func @transform_0(%arg0: i32) -> (i32, i32) {
    %c0_i32 = arith.constant 0 : i32
    %c0_i32_0 = arith.constant 0 : i32
    return %c0_i32, %arg0 : i32, i32
  }
  func.func @transform_1(%arg0: i32) -> (i32, i32) {
    %c0_i32 = arith.constant 0 : i32
    %c0_i32_0 = arith.constant 0 : i32
    %c0_i32_1 = arith.constant 0 : i32
    return %c0_i32, %c0_i32_0 : i32, i32
  }
  func.func @transform_2(%arg0: i32) -> (i32, i32) {
    %c0_i32 = arith.constant 0 : i32
    %c0_i32_0 = arith.constant 0 : i32
    %c0_i32_1 = arith.constant 0 : i32
    return %c0_i32, %c0_i32_0 : i32, i32
  }
  func.func @transform_3(%arg0: i32) -> (i32, i32) {
    %c0_i32 = arith.constant 0 : i32
    %c0_i32_0 = arith.constant 0 : i32
    %c0_i32_1 = arith.constant 0 : i32
    return %c0_i32, %c0_i32_0 : i32, i32
  }
  func.func @transform_4(%arg0: i32) -> (i32, i32) {
    %c0_i32 = arith.constant 0 : i32
    %c0_i32_0 = arith.constant 0 : i32
    %c0_i32_1 = arith.constant 0 : i32
    return %c0_i32, %c0_i32_0 : i32, i32
  }
  func.func @transform_5(%arg0: i32) -> (i32, i32) {
    %c0_i32 = arith.constant 0 : i32
    %c0_i32_0 = arith.constant 0 : i32
    %c0_i32_1 = arith.constant 0 : i32
    return %c0_i32, %c0_i32_0 : i32, i32
  }
  func.func @transform_6(%arg0: i32) -> (i32, i32) {
    %c0_i32 = arith.constant 0 : i32
    %c0_i32_0 = arith.constant 0 : i32
    %c0_i32_1 = arith.constant 0 : i32
    return %c0_i32, %c0_i32_0 : i32, i32
  }
  func.func @transform_7(%arg0: i32) -> (i32, i32) {
    %c0_i32 = arith.constant 0 : i32
    %c0_i32_0 = arith.constant 0 : i32
    return %c0_i32, %arg0 : i32, i32
  }
}

</mosaic_0001>

<bundles_post_ra>
// kernel: tpu_custom_call.1
= control target key start
LH: loop header
LB: loop body
LE: loop exit
PB: predicated region body
PF: predicated region fallthrough
CT: control target
= control target key end

     0   :  { %s1359_s0 = inlined_call_operand.vmem [shape: f32[3,512], index: 0, kind: input, shape index: {}]   ;;  %s1360_s1 = inlined_call_operand.vmem [shape: f32[50,3], index: 1, kind: input, shape index: {}]   ;;  %s1361_s2 = inlined_call_operand.vmem [shape: f32[50,1], index: 2, kind: input, shape index: {}]   ;;  %s1362_s3 = inlined_call_operand.vmem [shape: f32[50,50], index: 3, kind: input, shape index: {}]   ;;  %s1363_s4 = inlined_call_operand.vmem [shape: f32[50,1], index: 4, kind: input, shape index: {}]   ;;  %s1364_s5 = inlined_call_operand.vmem [shape: f32[1,50], index: 5, kind: input, shape index: {}]   ;;  %s1365_s6 = inlined_call_operand.<no memory space> [shape: f32[1,1], index: 6, kind: input, shape index: {}]   ;;  %s1366_s7 = inlined_call_operand.hbm [shape: f32[1,512], index: 7, kind: output, shape index: {}]  }
   0x1   :  { %v12_v0 = vstv %s1365_s6 }
   0x2   :  { %13 = vst [vmem:[#allocation2] sm:$0x1] %v12_v0 }
   0x3   :  { %14 = vsyncpa [#allocation4], 0 }
   0x4   :  { %16 = vsyncpa [#allocation4 + $0x1], 0  ;;  %s1139_s26 = smov 0   ;;  %s1141_s27 = smov 0  }
   0x5   :  { %s1143_s28 = smov 0   ;;  %s1145_s29 = smov 0  }
   0x6 LB: > { %s1160_s6 = sadd.s32 4294967295, %s1090_s29   ;;  %s869_s30 = sadd.s32 4294967294, %s1090_s29   ;;  %s1090_s29 = sphi %s1145_s29, %s1372_s29   ;;  %s1086_s28 = sphi %s1143_s28, %s1371_s28   ;;  %s1082_s27 = sphi %s1141_s27, %s1370_s27   ;;  %s1078_s26 = sphi %s1139_s26, %s1369_s26  }
   0x7   : > { %s1164_s8 = sadd.s32 1, %s1090_s29   ;;  %s181_s9 = sadd.s32 1, %s1086_s28 }
   0x8   : > { %s178_s10 = ssub.s32 %s1090_s29, %s1164_s8  ;;  %p191_p0 = scmp.ne.s32.totalorder %s1086_s28, %s1082_s27 }
   0x9   : > { %p179_p1 = scmp.eq.s32.totalorder %s178_s10, 0  ;;  %p192_p2 = scmp.eq.s32.totalorder %s1160_s6, 1 }
   0xa   : > { %p197_p3 = scmp.ne.s32.totalorder %s1082_s27, %s1078_s26  ;;  %p198_p4 = scmp.eq.s32.totalorder %s869_s30, 1 }
   0xb   : > { %s1175_s11 = scalar_select %p179_p1, %s1086_s28, %s181_s9  }
   0xc   : > { %p1177_p5 = por %p192_p2, %p191_p0  ;;  %p1181_p6 = por %p198_p4, %p197_p3 }
   0xd   : > { %p872_p7 = scmp.ge.s32.totalorder %s1090_s29, 1  ;;  %p243_p8 = scmp.lt.s32.totalorder %s1090_s29, 3 }
   0xf   : > { %p244_p9 = pnand %p872_p7, %p243_p8 }
  0x10   : > { %s874_s14 = sshll.u32 (!%p244_p9), %s1160_s6, 1  ;;  %v1092_v1 = vmov (!%p244_p9), 0.0   ;;  %v1093_v2 = vmov (!%p244_p9), 0   ;;  %v290_v3 = vld [vmem:[%s1361_s2] sm:$0xff] (!%p244_p9)  ;;  %v292_v4 = vld [vmem:[%s1361_s2 + $0x10] sm:$0xff] (!%p244_p9)  ;;  %v291_v5 = vld [vmem:[%s1361_s2 + $0x8] sm:$0xff] (!%p244_p9) }
  0x11   : > { %247 = sbr.rel (%p244_p9) target bundleno = 775 (0x307), region = 48  ;;  %p276_p10 = scmp.lt.s32.totalorder (!%p244_p9), %s874_s14, 3  ;;  %425 = vmatprep.mubr.f32.mxu0 (!%p244_p9), %v1092_v1  ;;  %624 = vmatprep.mubr.f32.mxu1 (!%p244_p9), %v1092_v1  ;;  %v293_v6 = vld [vmem:[%s1361_s2 + $0x18] sm:$0xff] (!%p244_p9)  ;;  %vm356_vm0 = vcmask (!%p244_p9), 1042432   ;;  %v294_v9 = vld [vmem:[%s1361_s2 + $0x20] sm:$0xff] (!%p244_p9)  ;;  %vm334_vm1 = vcmask (!%p244_p9), 23552  }
  0x12   : > { %969 = vset.pattern.permute.xlu0 (!%p244_p9), %v1093_v2  ;;  %970 = vset.pattern.permute.xlu1 (!%p244_p9), %v1093_v2  ;;  %v283_v10 = vld [vmem:[%s1360_s1] sm:$0xff] (!%p244_p9)  ;;  %v295_v11 = vld [vmem:[%s1361_s2 + $0x28] sm:$0xff] (!%p244_p9)  ;;  %v296_v12 = vld [vmem:[%s1361_s2 + $0x30] sm:$0x3] (!%p244_p9)  ;;  %vm553_vm2 = vcmask (!%p244_p9), 1041408   ;;  %vm531_vm3 = vcmask (!%p244_p9), 408576  }
  0x13   : > { %299 = vperm.xlu0 (!%p244_p9), %969, %v290_v3   ;;  %309 = vperm.xlu1 (!%p244_p9), %970, %v292_v4   ;;  %v284_v13 = vld [vmem:[%s1360_s1 + $0x8] sm:$0xff] (!%p244_p9)  ;;  %v489_v14 = vld [vmem:[%s1363_s4] sm:$0xff] (!%p244_p9)  ;;  %v285_v16 = vld [vmem:[%s1360_s1 + $0x10] sm:$0xff] (!%p244_p9)  ;;  %s272_s17 = sand.u32 (!%p244_p9), 1, %s1082_s27   ;;  %s902_s19 = sshll.u32 (!%p244_p9), %s1160_s6, 5 }
  0x14   : > { %v490_v15 = vld [vmem:[%s1363_s4 + $0x8] sm:$0xff] (!%p244_p9)  ;;  %v491_v17 = vld [vmem:[%s1363_s4 + $0x10] sm:$0xff] (!%p244_p9)  ;;  %v492_v18 = vld [vmem:[%s1363_s4 + $0x18] sm:$0xff] (!%p244_p9)  ;;  %s873_s18 = sshll.u32 (!%p244_p9), %s272_s17, 1  ;;  %s1317_s24 = scalar_lea.hbm (!%p244_p9), %s1366_s7, %s902_s19 }
  0x15   : > { %v286_v19 = vld [vmem:[%s1360_s1 + $0x18] sm:$0xff] (!%p244_p9)  ;;  %v493_v20 = vld [vmem:[%s1363_s4 + $0x20] sm:$0xff] (!%p244_p9)  ;;  %v494_v21 = vld [vmem:[%s1363_s4 + $0x28] sm:$0xff] (!%p244_p9)  ;;  %s274_s20 = scalar_lea.vmem (!%p244_p9), [#allocation3], %s873_s18  ;;  %s796_s25 = scalar_lea.sflag (!%p244_p9), [#allocation4], %s272_s17 }
  0x16   : > { %v287_v22 = vld [vmem:[%s1360_s1 + $0x20] sm:$0xff] (!%p244_p9)  ;;  %v495_v23 = vld [vmem:[%s1363_s4 + $0x30] sm:$0x3] (!%p244_p9)  ;;  %v288_v25 = vld [vmem:[%s1360_s1 + $0x28] sm:$0xff] (!%p244_p9)  ;;  %s1095_s6 = smov (!%p244_p9), [#allocation3]  }
  0x17   : > { %304 = vperm.xlu0 (!%p244_p9), %969, %v291_v5   ;;  %314 = vperm.xlu1 (!%p244_p9), %970, %v293_v6   ;;  %v682_v24 = vld [vmem:[#allocation2] sm:$0x1] (!%p244_p9)  ;;  %v289_v26 = vld [vmem:[%s1360_s1 + $0x30] sm:$0x3] (!%p244_p9)  ;;  %s1032_s9 = sshll.u32 (!%p244_p9), %s1095_s6, 4  ;;  %s1033_s9 = int_to_ptr.vmem [resolvable:$false] %s1032_s9 }
  0x18   : > { %s1374_s14 = smov (!%p276_p10, %s874_s14), 3  ;;  %s1034_s10 = scalar_lea.vmem %s1033_s9, 64 }
  0x19   : > { %s875_s21 = sshll.u32 %s1374_s14, 2 }
  0x1a   : > { %s279_s30 = scalar_lea.vmem %s1359_s0, %s875_s21  ;;  %s810_s21 = sshll.u32 %s274_s20, 4  ;;  %s1319_s21 = int_to_ptr.vmem [resolvable:$true] %s810_s21 }
  0x1b   : > { %v282_v7 = vld [vmem:[%s279_s30] sm:$0x77]  ;;  %319 = vperm.xlu0 %969, %v294_v9   ;;  %324 = vperm.xlu1 %970, %v295_v11   ;;  %s1028_s30 = scalar_lea.vmem %s1319_s21, 32  ;;  %p1035_p0 = scmp.lt.s32.totalorder %s1319_s21, %s1033_s9 }
  0x1c   : > { %v333_v8 = vcombine.high %v282_v7, %v282_v7  ;;  %p1029_p11 = scmp.ne.s32.totalorder %s1319_s21, %s1028_s30  ;;  %p1036_p1 = scmp.lt.s32.totalorder %s1034_s10, %s1028_s30 }
  0x1e   : > { %876 = vmatprep.subr.msk.mxu0 %vm356_vm0, %v333_v8  ;;  %p1030_p12 = pnand %p1029_p11, %p1177_p5  ;;  %p1037_p2 = por %p1036_p1, %p1035_p0 }
  0x1f   : > { %877 = vmatpush1.msk.msra.mxu0 %vm356_vm0, %v282_v7  ;;  %329 = vperm.xlu0 %969, %v296_v12  }
  0x20   : > { %878 = vmatmul.mubr.msk.f32.vlgmr.msra.gmra.mrb[0].mxu0 %vm334_vm1, %v283_v10  ;;  %498 = vperm.xlu1 %970, %v489_v14   ;;  %p1031_p13 = pneg %p1030_p12 }
  0x21   : > { %431 = vmatprep.mubr.f32.mxu0 %v1092_v1 }
  0x22   : > { %p1038_p3 = pnand %p1037_p2, %p1031_p13 }
  0x23   : > { %503 = vperm.xlu0 %969, %v490_v15  }
  0x24   : > { %879 = vmatmul.mubr.msk.f32.gmra.mrb[2].mxu0 %vm334_vm1, %v284_v13  ;;  %508 = vperm.xlu1 %970, %v491_v17  }
  0x25   : > { %437 = vmatprep.mubr.f32.mxu0 %v1092_v1 }
  0x27   : > { %513 = vperm.xlu0 %969, %v492_v18   ;;  %v482_v18 = vld [vmem:[%s1362_s3] sm:$0xff] }
  0x28   : > { %880 = vmatmul.mubr.msk.f32.gmra.mrb[4].mxu0 %vm334_vm1, %v285_v16  ;;  %518 = vperm.xlu1 %970, %v493_v20   ;;  %v483_v20 = vld [vmem:[%s1362_s3 + $0x8] sm:$0xff] }
  0x29   : > { %443 = vmatprep.mubr.f32.mxu0 %v1092_v1 }
  0x2b   : > { %523 = vperm.xlu0 %969, %v494_v21   ;;  %v484_v21 = vld [vmem:[%s1362_s3 + $0x10] sm:$0xff] }
  0x2c   : > { %881 = vmatmul.mubr.msk.f32.gmra.mrb[6].mxu0 %vm334_vm1, %v286_v19  ;;  %528 = vperm.xlu1 %970, %v495_v23   ;;  %v486_v23 = vld [vmem:[%s1362_s3 + $0x20] sm:$0xff] }
  0x2d   : > { %449 = vmatprep.mubr.f32.mxu0 %v1092_v1 }
  0x2f   : > { %685 = vperm.xlu0 %969, %v682_v24   ;;  %v487_v24 = vld [vmem:[%s1362_s3 + $0x28] sm:$0xff] }
  0x30   : > { %882 = vmatmul.mubr.msk.f32.gmra.mrb[8].mxu0 %vm334_vm1, %v287_v22  ;;  %v485_v22 = vld [vmem:[%s1362_s3 + $0x18] sm:$0xff] }
  0x31   : > { %455 = vmatprep.mubr.f32.mxu0 %v1092_v1 }
  0x34   : > { %883 = vmatmul.mubr.msk.f32.gmra.mrb[10].mxu0 %vm334_vm1, %v288_v25  ;;  %v488_v25 = vld [vmem:[%s1362_s3 + $0x30] sm:$0x3] }
  0x35   : > { %461 = vmatprep.mubr.f32.mxu0 %v1092_v1 }
  0x38   : > { %884 = vmatmul.mubr.msk.f32.gmra.mrb[12].mxu0 %vm334_vm1, %v289_v26 }
  0x39   : > { %765 = vmatprep.mubr.f32.mxu0 %v1092_v1 }
  0x92   : > { %v300_v27 = vpop.permute.xlu0 %299  ;;  %v310_v36 = vpop.permute.xlu1 %309 }
  0x96   : > { %v305_v32 = vpop.permute.xlu0 %304  ;;  %v315_v42 = vpop.permute.xlu1 %314 }
  0x9a   : > { %v320_v49 = vpop.permute.xlu0 %319  ;;  %v325_v58 = vpop.permute.xlu1 %324 }
  0x9e   : > { %v330_v4 = vpop.permute.xlu0 %329 }
  0x9f   : > { %v499_v26 = vpop.permute.xlu1 %498 }
  0xf3   : > { %v427_v28 = vpop.f32.mrb[0].mxu0 }
  0xf4   : > { %v428_v29 = vadd.f32 %v427_v28, %v300_v27  ;;  %v429_v30 = vpop.f32.mrb[1].mxu0 }
  0xf5   : > { %v430_v31 = vadd.f32 %v429_v30, %v300_v27 }
  0xf6   : > { %972 = vtanh.f32 %v428_v29 }
  0xf7   : > { %v433_v33 = vpop.f32.mrb[2].mxu0  ;;  %974 = vtanh.f32 %v430_v31  ;;  %v504_v31 = vpop.permute.xlu0 %503 }
  0xf8   : > { %v434_v34 = vadd.f32 %v433_v33, %v305_v32  ;;  %v435_v35 = vpop.f32.mrb[3].mxu0 }
  0xf9   : > { %v436_v37 = vadd.f32 %v435_v35, %v305_v32 }
  0xfa   : > { %976 = vtanh.f32 %v434_v34 }
  0xfb   : > { %978 = vtanh.f32 %v436_v37  ;;  %v439_v38 = vpop.f32.mrb[4].mxu0 }
  0xfc   : > { %v440_v39 = vadd.f32 %v439_v38, %v310_v36  ;;  %v441_v40 = vpop.f32.mrb[5].mxu0 }
  0xfd   : > { %v442_v41 = vadd.f32 %v441_v40, %v310_v36  ;;  %v514_v40 = vpop.permute.xlu0 %513 }
  0xfe   : > { %980 = vtanh.f32 %v440_v39 }
  0xff   : > { %v445_v43 = vpop.f32.mrb[6].mxu0  ;;  %982 = vtanh.f32 %v442_v41 }
 0x100   : > { %v446_v44 = vadd.f32 %v445_v43, %v315_v42  ;;  %v447_v45 = vpop.f32.mrb[7].mxu0  ;;  %v973_v47 = vpop.eup %972 }
 0x101   : > { %v448_v46 = vadd.f32 %v447_v45, %v315_v42  ;;  %v975_v48 = vpop.eup %974 }
 0x102   : > { %984 = vtanh.f32 %v446_v44 }
 0x103   : > { %986 = vtanh.f32 %v448_v46  ;;  %v451_v50 = vpop.f32.mrb[8].mxu0 }
 0x104   : > { %v977_v51 = vpop.eup %976  ;;  %v452_v52 = vadd.f32 %v451_v50, %v320_v49  ;;  %v453_v53 = vpop.f32.mrb[9].mxu0 }
 0x105   : > { %v979_v54 = vpop.eup %978  ;;  %v454_v55 = vadd.f32 %v453_v53, %v320_v49  ;;  %v905_v56 = vpack.c.bf16 %v977_v51, %v973_v47 }
 0x106   : > { %v903_v57 = vpack.c.bf16 %v979_v54, %v975_v48  ;;  %988 = vtanh.f32 %v452_v52 }
 0x107   : > { %v457_v59 = vpop.f32.mrb[10].mxu0  ;;  %990 = vtanh.f32 %v454_v55 }
 0x108   : > { %v458_v60 = vadd.f32 %v457_v59, %v325_v58  ;;  %v459_v61 = vpop.f32.mrb[11].mxu0  ;;  %904 = vmatprep.subr.bf16.mxu1 %v903_v57  ;;  %v981_v63 = vpop.eup %980 }
 0x109   : > { %v460_v62 = vadd.f32 %v459_v61, %v325_v58  ;;  %906 = vmatpush1.bf16.msra.mxu1 %v905_v56  ;;  %v983_v0 = vpop.eup %982  ;;  %v524_v56 = vpop.permute.xlu0 %523 }
 0x10a   : > { %992 = vtanh.f32 %v458_v60 }
 0x10b   : > { %994 = vtanh.f32 %v460_v62  ;;  %v463_v2 = vpop.f32.mrb[12].mxu0 }
 0x10c   : > { %v985_v3 = vpop.eup %984  ;;  %v465_v5 = vpop.f32.mrb[13].mxu0  ;;  %v464_v9 = vadd.f32 %v463_v2, %v330_v4 }
 0x10d   : > { %v987_v6 = vpop.eup %986  ;;  %v466_v7 = vadd.f32 %v465_v5, %v330_v4  ;;  %v909_v8 = vpack.c.bf16 %v985_v3, %v981_v63 }
 0x10e   : > { %v907_v10 = vpack.c.bf16 %v987_v6, %v983_v0 }
 0x10f   : > { %996 = vtanh.f32 %v466_v7 }
 0x110   : > { %908 = vmatprep.subr.bf16.mxu1 %v907_v10  ;;  %v989_v11 = vpop.eup %988  ;;  %998 = vtanh.f32 %v464_v9 }
 0x111   : > { %910 = vmatpush1.bf16.msra.mxu1 %v909_v8  ;;  %v991_v12 = vpop.eup %990 }
 0x114   : > { %v993_v13 = vpop.eup %992 }
 0x115   : > { %v995_v14 = vpop.eup %994  ;;  %v913_v15 = vpack.c.bf16 %v993_v13, %v989_v11 }
 0x116   : > { %v911_v16 = vpack.c.bf16 %v995_v14, %v991_v12 }
 0x118   : > { %912 = vmatprep.subr.bf16.mxu1 %v911_v16  ;;  %v681_v16 = vld [vmem:[%s1364_s5] sm:$0x1] }
 0x119   : > { %v997_v17 = vpop.eup %996  ;;  %914 = vmatpush1.bf16.msra.mxu1 %v913_v15 }
 0x11a   : > { %885 = vmatprep.subr.msk.mxu1 %vm553_vm2, %v997_v17  ;;  %v999_v19 = vpop.eup %998 }
 0x11d   : > { %886 = vmatpush1.msk.msra.mxu1 %vm553_vm2, %v999_v19 }
 0x11e   : > { %887 = vmatmul.mubr.msk.f32.vlgmr.msra.gmra.mrb[0].mxu1 %vm531_vm3, %v482_v18  ;;  %v688_v18 = vlaneseq }
 0x11f   : > { %630 = vmatprep.mubr.f32.mxu1 %v1092_v1 }
 0x120   : > { %v689_v19 = vshrl.u32 %v688_v18, 7  ;;  %vm792_vm4 = vcmp.lt.s32.totalorder %v688_v18, 256 }
 0x122   : > { %888 = vmatmul.mubr.msk.f32.gmra.mrb[2].mxu1 %vm531_vm3, %v483_v20  ;;  %v1094_v20 = vmov 1966171168  }
 0x123   : > { %636 = vmatprep.mubr.f32.mxu1 %v1092_v1 }
 0x126   : > { %889 = vmatmul.mubr.msk.f32.gmra.mrb[4].mxu1 %vm531_vm3, %v484_v21  ;;  %v776_v21 = vunpack.c.l.s4 %v1094_v20 }
 0x127   : > { %642 = vmatprep.mubr.f32.mxu1 %v1092_v1 }
 0x12a   : > { %890 = vmatmul.mubr.msk.f32.gmra.mrb[6].mxu1 %vm531_vm3, %v485_v22  ;;  %v690_v22 = vsub.s32 0, %v689_v19 }
 0x12b   : > { %648 = vmatprep.mubr.f32.mxu1 %v1092_v1 }
 0x12e   : > { %891 = vmatmul.mubr.msk.f32.gmra.mrb[8].mxu1 %vm531_vm3, %v486_v23  ;;  %v686_v23 = vpop.permute.xlu0 %685 }
 0x12f   : > { %654 = vmatprep.mubr.f32.mxu1 %v1092_v1 }
 0x132   : > { %892 = vmatmul.mubr.msk.f32.gmra.mrb[10].mxu1 %vm531_vm3, %v487_v24  ;;  %v777_v24 = vunpack.c.0.s8 %v776_v21 }
 0x133   : > { %660 = vmatprep.mubr.f32.mxu1 %v1092_v1  ;;  %v509_v1 = vpop.permute.xlu1 %508 }
 0x136   : > { %893 = vmatmul.mubr.msk.f32.gmra.mrb[12].mxu1 %vm531_vm3, %v488_v25  ;;  %v691_v25 = vrot.slane %v686_v23, %v690_v22 }
 0x137   : > { %v519_v47 = vpop.permute.xlu1 %518 }
 0x13b   : > { %v529_v2 = vpop.permute.xlu1 %528 }
 0x1f1   : > { %v626_v27 = vpop.f32.mrb[0].mxu1 }
 0x1f2   : > { %v627_v28 = vadd.f32 %v626_v27, %v499_v26  ;;  %v628_v29 = vpop.f32.mrb[1].mxu1 }
 0x1f3   : > { %v629_v30 = vadd.f32 %v628_v29, %v499_v26 }
 0x1f4   : > { %1000 = vtanh.f32 %v627_v28 }
 0x1f5   : > { %v632_v32 = vpop.f32.mrb[2].mxu1  ;;  %1002 = vtanh.f32 %v629_v30  ;;  %v780_v30 = vsub.s32 %v777_v24, %v689_v19 }
 0x1f6   : > { %v633_v33 = vadd.f32 %v632_v32, %v504_v31  ;;  %v634_v34 = vpop.f32.mrb[3].mxu1 }
 0x1f7   : > { %v635_v35 = vadd.f32 %v634_v34, %v504_v31 }
 0x1f8   : > { %1004 = vtanh.f32 %v633_v33 }
 0x1f9   : > { %1006 = vtanh.f32 %v635_v35  ;;  %v638_v36 = vpop.f32.mrb[4].mxu1 }
 0x1fa   : > { %v639_v37 = vadd.f32 %v638_v36, %v509_v1  ;;  %v640_v38 = vpop.f32.mrb[5].mxu1 }
 0x1fb   : > { %v641_v39 = vadd.f32 %v640_v38, %v509_v1 }
 0x1fc   : > { %1008 = vtanh.f32 %v639_v37 }
 0x1fd   : > { %v644_v41 = vpop.f32.mrb[6].mxu1  ;;  %1010 = vtanh.f32 %v641_v39 }
 0x1fe   : > { %v645_v42 = vadd.f32 %v644_v41, %v514_v40  ;;  %v646_v43 = vpop.f32.mrb[7].mxu1  ;;  %v1001_v45 = vpop.eup %1000 }
 0x1ff   : > { %v647_v44 = vadd.f32 %v646_v43, %v514_v40  ;;  %v1003_v46 = vpop.eup %1002 }
 0x200   : > { %1012 = vtanh.f32 %v645_v42 }
 0x201   : > { %1014 = vtanh.f32 %v647_v44  ;;  %v650_v48 = vpop.f32.mrb[8].mxu1 }
 0x202   : > { %v1005_v49 = vpop.eup %1004  ;;  %v651_v50 = vadd.f32 %v650_v48, %v519_v47  ;;  %v652_v51 = vpop.f32.mrb[9].mxu1 }
 0x203   : > { %v1007_v52 = vpop.eup %1006  ;;  %v653_v53 = vadd.f32 %v652_v51, %v519_v47  ;;  %v917_v54 = vpack.c.bf16 %v1005_v49, %v1001_v45 }
 0x204   : > { %v915_v55 = vpack.c.bf16 %v1007_v52, %v1003_v46  ;;  %1016 = vtanh.f32 %v651_v50 }
 0x205   : > { %v656_v57 = vpop.f32.mrb[10].mxu1  ;;  %1018 = vtanh.f32 %v653_v53 }
 0x206   : > { %v657_v58 = vadd.f32 %v656_v57, %v524_v56  ;;  %v658_v59 = vpop.f32.mrb[11].mxu1  ;;  %916 = vmatprep.subr.bf16.mxu0 %v915_v55  ;;  %v1009_v61 = vpop.eup %1008 }
 0x207   : > { %v659_v60 = vadd.f32 %v658_v59, %v524_v56  ;;  %918 = vmatpush1.bf16.msra.mxu0 %v917_v54  ;;  %v1011_v62 = vpop.eup %1010 }
 0x208   : > { %1020 = vtanh.f32 %v657_v58 }
 0x209   : > { %1022 = vtanh.f32 %v659_v60  ;;  %v662_v63 = vpop.f32.mrb[12].mxu1 }
 0x20a   : > { %v1013_v0 = vpop.eup %1012  ;;  %v664_v3 = vpop.f32.mrb[13].mxu1  ;;  %v663_v7 = vadd.f32 %v662_v63, %v529_v2 }
 0x20b   : > { %v1015_v4 = vpop.eup %1014  ;;  %v665_v5 = vadd.f32 %v664_v3, %v529_v2  ;;  %v921_v6 = vpack.c.bf16 %v1013_v0, %v1009_v61 }
 0x20c   : > { %v919_v8 = vpack.c.bf16 %v1015_v4, %v1011_v62 }
 0x20d   : > { %1024 = vtanh.f32 %v665_v5 }
 0x20e   : > { %920 = vmatprep.subr.bf16.mxu0 %v919_v8  ;;  %v1017_v9 = vpop.eup %1016  ;;  %1026 = vtanh.f32 %v663_v7 }
 0x20f   : > { %922 = vmatpush1.bf16.msra.mxu0 %v921_v6  ;;  %v1019_v10 = vpop.eup %1018 }
 0x212   : > { %v1021_v11 = vpop.eup %1020 }
 0x213   : > { %v1023_v12 = vpop.eup %1022  ;;  %v925_v13 = vpack.c.bf16 %v1021_v11, %v1017_v9 }
 0x214   : > { %v923_v14 = vpack.c.bf16 %v1023_v12, %v1019_v10 }
 0x216   : > { %924 = vmatprep.subr.bf16.mxu0 %v923_v14 }
 0x217   : > { %v1025_v15 = vpop.eup %1024  ;;  %926 = vmatpush1.bf16.msra.mxu0 %v925_v13 }
 0x218   : > { %894 = vmatprep.subr.msk.mxu0 %vm553_vm2, %v1025_v15  ;;  %v1027_v17 = vpop.eup %1026 }
 0x21b   : > { %895 = vmatpush1.msk.msra.mxu0 %vm553_vm2, %v1027_v17 }
 0x21c   : > { %896 = vmatmul.mubr.msk.f32.vlgmr.msra.gmra.mrb[14].mxu0 %vm531_vm3, %v681_v16 }
 0x2ef   : > { %v767_v26 = vpop.f32.mrb[14].mxu0 }
 0x2f0   : > { %v768_v27 = vadd.f32 %v767_v26, %v691_v25  ;;  %v769_v28 = vpop.f32.mrb[15].mxu0 }
 0x2f1   : > { %v770_v29 = vadd.f32 %v769_v28, %v691_v25 }
 0x2f3   : > { %v774_v31 = vcombine.low %v768_v27, %v770_v29 }
 0x2f5   : > { %v781_v32 = vrot.slane %v774_v31, %v780_v30 }
 0x2f7   : > { %v788_v33 = vrot.slane %v781_v32, %v780_v30 }
 0x2f9   : > { %794 = vst.msk [vmem:[%s274_s20] sm:$0x3] %vm792_vm4, %v788_v33 }
 0x2fa   : > { %1041 = shalt.err (!%p1038_p3)
}
 0x2fb   : > { %s1042_s15 = scalar_lea.hbm %s1317_s24, 32  ;;  %s1046_s17 = scalar_lea.hbm %s1366_s7, 64 }
 0x2fc   : > { %p1043_p4 = scmp.ne.s32.totalorder %s1317_s24, %s1042_s15  ;;  %p1047_p9 = scmp.lt.u32.totalorder %s1317_s24, %s1366_s7 }
 0x2fd   : > { %p1048_p10 = scmp.lt.u32.totalorder %s1046_s17, %s1042_s15  ;;  %p1050_p12 = scmp.lt.u32.totalorder %s1042_s15, %s1317_s24 }
 0x2fe   : > { %p1044_p7 = pnand %p1043_p4, %p1177_p5 }
 0x2ff   : > { %p1049_p11 = por %p1048_p10, %p1047_p9 }
 0x300   : > { %p1045_p8 = pneg %p1044_p7 }
 0x301   : > { %p1051_p13 = por %p1050_p12, %p1049_p11 }
 0x303   : > { %p1052_p0 = pnand %p1051_p13, %p1045_p8 }
 0x305   : > { %1055 = shalt.err (!%p1052_p0)
}
 0x306   : > { %927 = dma.vmem_to_hbm [thread:$0]  (%p1177_p5), %s1319_s21, 32, %s1317_s24, %s796_s25  }
 0x307 PF: > { %p933_p1 = scmp.ge.s32.totalorder %s1090_s29, 2  ;;  %s822_s20 = sand.u32 1, %s1078_s26  }
 0x308   : > { %s823_s22 = scalar_lea.sflag [#allocation4], %s822_s20 }
 0x309   : > { %p930_p2 = pnand %p933_p1, %p1181_p6 }
 0x30b   : > { %1073 = dma.done.wait (!%p930_p2), %s823_s22, 32  }
 0x30c   : > { %1075 = vsyncadd (!%p930_p2), %s823_s22, 4294967264  ;;  %p19_p3 = scmp.ge.s32.totalorder %s1164_s8, 4   ;;  %s1369_s26 = smov %s1082_s27 }
 0x30d   : > { %s1370_s27 = smov %s1086_s28  ;;  %s1371_s28 = smov %s1175_s11 }
 0x30e   : > { %s1372_s29 = smov %s1164_s8  ;;  %21 = sbr.rel (!%p19_p3) target bundleno = 6 (0x6), region = 83 }
 0x315   :  { %828 = vsyncpa [#allocation4], 1 }
 0x316   :  { %830 = vsyncpa [#allocation4 + $0x1], 1 }

</bundles_post_ra>
